<compile_context>
chip_gen: v5e
topology: v5e:2x2
jax: 0.10.0
libtpu: 0.0.40
codegen_flags: <defaults>
</compile_context>

<pallas_src>
import math
import functools

import jax
import jax.numpy as jnp
from jax import lax
from jax.experimental import pallas as pl
from jax.experimental.pallas import tpu as pltpu


_MASK_VALUE = -0.7 * float(jnp.finfo(jnp.float32).max)


def _tpu_defaults():
    """Generation-dependent VMEM budget + tile defaults (v7x has 64 MiB/TC)."""
    phys = None
    try:
        info = pltpu.get_tpu_info()
        phys = int(getattr(info, "vmem_capacity_bytes", 0)) or None
    except Exception:
        phys = None
    if phys is None:
        phys = 64 * 1024 * 1024                       # conservative (v7x-sized)
    if phys >= 100 * 1024 * 1024:                     # v5e / v6e: 128 MiB physical
        return dict(vmem_limit=96 * 1024 * 1024,
                    linear_block=(512, 1024, 1024),
                    attn_block=(256, 512))
    return dict(vmem_limit=44 * 1024 * 1024,          # v7x: 64 MiB per TensorCore
                linear_block=(512, 512, 512),
                attn_block=(256, 512))


_DEFAULTS = _tpu_defaults()
_VMEM_LIMIT = _DEFAULTS["vmem_limit"]


def _pick_tile(dim, target, aligns):
    """Largest tile <= target dividing `dim`, preferring larger alignments.
    Falls back to the full dim (callers assert the VMEM estimate afterwards)."""
    if dim <= target:
        return dim
    for a in aligns:
        if a > target:
            continue
        t = (target // a) * a
        while t >= a:
            if dim % t == 0:
                return t
            t -= a
    return dim


# ----------------------------------------------------------------------------
# Tiled linear kernel: (M, K) @ (K, N) -> (M, N), bf16 operands, f32 accumulate
# ----------------------------------------------------------------------------
def _matmul_kernel(x_ref, w_ref, o_ref, acc_ref):
    @pl.when(pl.program_id(2) == 0)
    def _init():
        acc_ref[...] = jnp.zeros(acc_ref.shape, acc_ref.dtype)

    acc_ref[...] += jnp.dot(x_ref[...], w_ref[...],
                            preferred_element_type=jnp.float32)

    @pl.when(pl.program_id(2) == pl.num_programs(2) - 1)
    def _flush():
        o_ref[...] = acc_ref[...].astype(o_ref.dtype)


def pallas_linear(x, w, *, block=None, out_dtype=jnp.float32):
    """x: (M, K), w: (K, N) -> (M, N). Tiled + pipelined, f32 VMEM accumulator."""
    if block is None:
        block = _DEFAULTS["linear_block"]
    M, K = x.shape
    K2, N = w.shape
    assert K == K2
    tm = _pick_tile(M, block[0], (16, 8))          # bf16 sublane packing
    tn = _pick_tile(N, block[1], (256, 128))       # keep 256-wide MXU full
    tk = _pick_tile(K, block[2], (256, 128))
    grid = (M // tm, N // tn, K // tk)

    in_b = jnp.dtype(x.dtype).itemsize
    out_b = jnp.dtype(out_dtype).itemsize
    vmem_est = (2 * (tm * tk + tk * tn) * in_b      # double-buffered inputs
                + 2 * tm * tn * out_b               # double-buffered output
                + tm * tn * 4)                      # f32 accumulator
    if vmem_est > _VMEM_LIMIT:
        raise ValueError(f"linear tile ({tm},{tn},{tk}) needs ~{vmem_est} B VMEM "
                         f"> limit {_VMEM_LIMIT}; pass a smaller `block`")

    flops = 2 * M * N * K
    bytes_accessed = (M * K + K * N) * in_b + M * N * out_b

    return pl.pallas_call(
        _matmul_kernel,
        out_shape=jax.ShapeDtypeStruct((M, N), out_dtype),
        grid=grid,
        in_specs=[
            pl.BlockSpec((tm, tk), lambda i, j, k: (i, k)),
            pl.BlockSpec((tk, tn), lambda i, j, k: (k, j)),
        ],
        out_specs=pl.BlockSpec((tm, tn), lambda i, j, k: (i, j)),
        scratch_shapes=[pltpu.VMEM((tm, tn), jnp.float32)],
        compiler_params=pltpu.CompilerParams(
            dimension_semantics=("parallel", "parallel", "arbitrary"),
            vmem_limit_bytes=_VMEM_LIMIT),
        cost_estimate=pl.CostEstimate(flops=int(flops), transcendentals=0,
                                      bytes_accessed=int(bytes_accessed)),
    )(x, w)


# ----------------------------------------------------------------------------
# Flash attention kernel (causal, GQA-grouped, online softmax, fused RoPE)
#   qkv: (B, S, (H + 2*Hkv)*d) bf16  -- fused projection output, features
#        laid out [q heads | k heads | v heads].
#   cos, sin_signed: (B, S, d) f32   -- sin already has the rotate_half sign
#        folded in (first half negated), so rope(x) = x*cos + roll(x,d/2)*sin.
#   out: (B, S, H*d) bf16
# Grid: (B, Hkv, n_tri_steps) -- lower-triangular (qi, ki) schedule prefetched
#       as scalar tables; the step axis is the reduction ("arbitrary").
# ----------------------------------------------------------------------------
def _flash_attn_kernel(qi_tab, ki_tab, q_ref, k_ref, v_ref,
                       cq_ref, sq_ref, ck_ref, sk_ref, o_ref,
                       m_ref, l_ref, acc_ref, qr_ref,
                       *, n_rep, d, tq, tk, scale):
    step = pl.program_id(2)
    qi = qi_tab[step]
    ki = ki_tab[step]
    q_start = qi * tq
    k_start = ki * tk
    h = d // 2

    @pl.when(ki == 0)
    def _init():
        m_ref[...] = jnp.full(m_ref.shape, -jnp.inf, jnp.float32)
        l_ref[...] = jnp.zeros(l_ref.shape, jnp.float32)
        acc_ref[...] = jnp.zeros(acc_ref.shape, jnp.float32)
        # RoPE (+ 1/sqrt(d) scale) on the q tile, once per q tile, cached in VMEM.
        cq = cq_ref[0]                                  # (tq, d) f32
        sq = sq_ref[0]                                  # (tq, d) f32 (sign-folded)
        q_all = q_ref[0].astype(jnp.float32)            # (tq, n_rep*d)
        for r in range(n_rep):
            qh = q_all[:, r * d:(r + 1) * d]
            qrot = jnp.concatenate([qh[:, h:], qh[:, :h]], axis=-1)
            qe = (qh * cq + qrot * sq) * scale
            qr_ref[:, r * d:(r + 1) * d] = qe.astype(qr_ref.dtype)

    # RoPE on the K tile (per kv step; VPU work hidden under the MXU).
    k_t = k_ref[0].astype(jnp.float32)                  # (tk, d)
    krot = jnp.concatenate([k_t[:, h:], k_t[:, :h]], axis=-1)
    k_e = (k_t * ck_ref[0] + krot * sk_ref[0]).astype(jnp.bfloat16)
    v_t = v_ref[0]                                      # (tk, d) bf16

    # Causal mask built in-kernel from tile coordinates (no HBM mask DMA).
    rows = q_start + lax.broadcasted_iota(jnp.int32, (tq, tk), 0)
    cols = k_start + lax.broadcasted_iota(jnp.int32, (tq, tk), 1)
    causal = rows >= cols

    p_parts = []
    alphas = []
    for r in range(n_rep):                              # static unroll over group
        q_e = qr_ref[:, r * d:(r + 1) * d]              # (tq, d) bf16, rope'd+scaled
        s = lax.dot_general(q_e, k_e, (((1,), (1,)), ((), ())),
                            preferred_element_type=jnp.float32)      # (tq, tk)
        s = jnp.where(causal, s, _MASK_VALUE)
        m_prev = m_ref[:, r:r + 1]                      # (tq, 1)
        m_new = jnp.maximum(m_prev, jnp.max(s, axis=-1, keepdims=True))
        alpha = jnp.exp(m_prev - m_new)
        p = jnp.exp(s - m_new)                          # (tq, tk) f32
        l_ref[:, r:r + 1] = alpha * l_ref[:, r:r + 1] + jnp.sum(p, axis=-1,
                                                                keepdims=True)
        m_ref[:, r:r + 1] = m_new
        p_parts.append(p.astype(v_t.dtype))
        alphas.append(alpha)

    # One stacked (n_rep*tq, tk) @ (tk, d) P.V matmul per kv step.
    p_stack = jnp.concatenate(p_parts, axis=0) if n_rep > 1 else p_parts[0]
    pv = jnp.dot(p_stack, v_t, preferred_element_type=jnp.float32)   # (n_rep*tq, d)
    for r in range(n_rep):
        acc_ref[:, r * d:(r + 1) * d] = (alphas[r] * acc_ref[:, r * d:(r + 1) * d]
                                         + pv[r * tq:(r + 1) * tq, :])

    last_ki = (q_start + tq - 1) // tk
    @pl.when(ki == last_ki)
    def _finalize():
        outs = []
        for r in range(n_rep):
            inv_l = pl.reciprocal(l_ref[:, r:r + 1], approx=True)    # (tq, 1)
            outs.append((acc_ref[:, r * d:(r + 1) * d] * inv_l).astype(o_ref.dtype))
        # Single lane-dense (tq, n_rep*d) store of the whole output tile.
        o_ref[0] = jnp.concatenate(outs, axis=-1) if n_rep > 1 else outs[0]


def flash_attention(qkv, cos, sin_signed, *, B, S, num_heads, num_kv_heads,
                    head_dim, scale, block=None):
    """qkv: (B,S,(H+2Hkv)*d) bf16, cos/sin_signed: (B,S,d) f32 -> (B,S,H*d) bf16."""
    if block is None:
        block = _DEFAULTS["attn_block"]
    H, Hkv, d = num_heads, num_kv_heads, head_dim
    n_rep = H // Hkv
    assert d % 128 == 0, "head_dim must be a multiple of 128 (Llama head_dim=128)"
    assert qkv.shape == (B, S, (H + 2 * Hkv) * d)

    tq = _pick_tile(S, block[0], (16, 8))
    tk = _pick_tile(S, block[1], (16, 8))
    nq, nk = S // tq, S // tk
    nrd = n_rep * d

    # VMEM fit guard (covers the _pick_tile full-dim fallback).
    vmem_est = (2 * tq * nrd * 2 + 2 * 2 * tk * d * 2          # q, k+v (double buf)
                + 2 * 2 * tq * d * 4 + 2 * 2 * tk * d * 4      # cos/sin blocks
                + 2 * tq * nrd * 2                              # out (double buf)
                + tq * nrd * 4 + tq * nrd * 2                   # acc + rope'd q
                + 2 * tq * 128 * 4)                             # m/l (lane padded)
    if vmem_est > _VMEM_LIMIT:
        raise ValueError(f"attention tiles (tq={tq}, tk={tk}) need ~{vmem_est} B "
                         f"VMEM > limit {_VMEM_LIMIT}; pass a smaller `block`")

    # Flattened lower-triangular (qi, ki) schedule: only causally-needed tiles.
    qis, kis = [], []
    for qi in range(nq):
        last = min((qi * tq + tq - 1) // tk, nk - 1)
        for ki in range(last + 1):
            qis.append(qi)
            kis.append(ki)
    n_steps = len(qis)
    qi_steps = jnp.asarray(qis, jnp.int32)
    ki_steps = jnp.asarray(kis, jnp.int32)

    kern = functools.partial(_flash_attn_kernel, n_rep=n_rep, d=d, tq=tq, tk=tk,
                             scale=scale)

    # Feature-block offsets inside the fused qkv activation:
    #   q group g -> block g (size n_rep*d); k head g -> block H+g (size d);
    #   v head g -> block H+Hkv+g (size d).
    def q_map(b, g, s, qi_r, ki_r):
        return (b, qi_r[s], g)

    def k_map(b, g, s, qi_r, ki_r):
        return (b, ki_r[s], H + g)

    def v_map(b, g, s, qi_r, ki_r):
        return (b, ki_r[s], H + Hkv + g)

    def cq_map(b, g, s, qi_r, ki_r):
        return (b, qi_r[s], 0)

    def ck_map(b, g, s, qi_r, ki_r):
        return (b, ki_r[s], 0)

    def o_map(b, g, s, qi_r, ki_r):
        return (b, qi_r[s], g)

    flops = 2 * B * H * S * S * d                      # ~causal half of 4*B*H*S*S*d
    transcendentals = (B * H * S * S) // 2
    bytes_accessed = (B * S * (H + 2 * Hkv) * d * 2 + B * S * H * d * 2
                      + 2 * B * S * d * 4)

    return pl.pallas_call(
        kern,
        out_shape=jax.ShapeDtypeStruct((B, S, H * d), jnp.bfloat16),
        grid_spec=pltpu.PrefetchScalarGridSpec(
            num_scalar_prefetch=2,
            grid=(B, Hkv, n_steps),
            in_specs=[
                pl.BlockSpec((1, tq, nrd), q_map),     # q  (group of n_rep heads)
                pl.BlockSpec((1, tk, d), k_map),       # k  (one kv head)
                pl.BlockSpec((1, tk, d), v_map),       # v  (one kv head)
                pl.BlockSpec((1, tq, d), cq_map),      # cos  (q rows)
                pl.BlockSpec((1, tq, d), cq_map),      # sin  (q rows, sign-folded)
                pl.BlockSpec((1, tk, d), ck_map),      # cos  (k rows)
                pl.BlockSpec((1, tk, d), ck_map),      # sin  (k rows, sign-folded)
            ],
            out_specs=pl.BlockSpec((1, tq, nrd), o_map),
            scratch_shapes=[
                pltpu.VMEM((tq, n_rep), jnp.float32),   # running max m
                pltpu.VMEM((tq, n_rep), jnp.float32),   # running sum l
                pltpu.VMEM((tq, nrd), jnp.float32),     # accumulator
                pltpu.VMEM((tq, nrd), jnp.bfloat16),    # rope'd + scaled q tile
            ]),
        compiler_params=pltpu.CompilerParams(
            dimension_semantics=("parallel", "parallel", "arbitrary"),
            vmem_limit_bytes=_VMEM_LIMIT),
        cost_estimate=pl.CostEstimate(flops=int(flops),
                                      transcendentals=int(transcendentals),
                                      bytes_accessed=int(bytes_accessed)),
    )(qi_steps, ki_steps, qkv, qkv, qkv, cos, sin_signed, cos, sin_signed)


# ----------------------------------------------------------------------------
# RoPE (LlamaRotaryEmbedding + apply_rotary_pos_emb) — host-side cos/sin tables
# ----------------------------------------------------------------------------
def rotary_cos_sin(position_ids, head_dim, rope_theta):
    if position_ids.ndim == 1:
        position_ids = position_ids[None, :]
    inv_freq = 1.0 / (rope_theta ** (jnp.arange(0, head_dim, 2,
                                                dtype=jnp.float32) / head_dim))
    freqs = position_ids.astype(jnp.float32)[..., None] * inv_freq      # (B?,S,d/2)
    emb = jnp.concatenate([freqs, freqs], axis=-1)                      # (B?,S,d)
    return jnp.cos(emb), jnp.sin(emb)


def _rotate_half(x):
    h = x.shape[-1] // 2
    return jnp.concatenate([-x[..., h:], x[..., :h]], axis=-1)


def apply_rope_bhsd(x, cos, sin):
    # x: (B, Hx, S, d); cos/sin: (Bc, S, d)   (reference layout)
    return x * cos[:, None, :, :] + _rotate_half(x) * sin[:, None, :, :]


# ----------------------------------------------------------------------------
# Module wrapper
# ----------------------------------------------------------------------------
class LlamaAttentionKVmixPallas:
    def __init__(self, hidden_size, num_heads, num_kv_heads, rope_theta, key,
                 linear_block=None, attn_block=None):
        self.hidden_size = hidden_size
        self.num_heads = num_heads
        self.num_kv_heads = num_kv_heads
        self.head_dim = hidden_size // num_heads
        self.n_rep = num_heads // num_kv_heads
        self.rope_theta = rope_theta
        self.linear_block = linear_block
        self.attn_block = attn_block

        k1, k2, k3, k4 = jax.random.split(key, 4)
        lim = 1.0 / math.sqrt(hidden_size)

        def init(k, shape):
            return jax.random.uniform(k, shape, jnp.float32, -lim, lim)

        # stored (in_features, out_features); config.attention_bias = False
        self.w_q = init(k1, (hidden_size, num_heads * self.head_dim))
        self.w_k = init(k2, (hidden_size, num_kv_heads * self.head_dim))
        self.w_v = init(k3, (hidden_size, num_kv_heads * self.head_dim))
        self.w_o = init(k4, (num_heads * self.head_dim, hidden_size))
        # Fused QKV weight (bf16) for the single projection kernel call.
        self.w_qkv_bf = jnp.concatenate([self.w_q, self.w_k, self.w_v],
                                        axis=1).astype(jnp.bfloat16)
        self.w_o_bf = self.w_o.astype(jnp.bfloat16)

    def __call__(self, hidden_states, attention_mask=None, position_ids=None):
        # TODO(synk): attention_mask is assumed to be the standard causal mask;
        #             it is regenerated in-kernel, arbitrary additive masks are
        #             not supported.
        B, S, E = hidden_states.shape
        H, Hkv, d = self.num_heads, self.num_kv_heads, self.head_dim
        if position_ids is None:
            position_ids = jnp.arange(S, dtype=jnp.int32)

        # Fused QKV projection: one kernel, one read of the activations.
        x2d = hidden_states.reshape(B * S, E).astype(jnp.bfloat16)
        qkv = pallas_linear(x2d, self.w_qkv_bf, block=self.linear_block,
                            out_dtype=jnp.bfloat16)
        qkv = qkv.reshape(B, S, (H + 2 * Hkv) * d)      # free reshape

        # cos / sign-folded sin tables for the in-kernel RoPE.
        cos, sin = rotary_cos_sin(position_ids, d, self.rope_theta)   # (B?,S,d) f32
        sign = jnp.concatenate([-jnp.ones((d // 2,), jnp.float32),
                                jnp.ones((d // 2,), jnp.float32)])
        sin_signed = sin * sign
        cos = jnp.broadcast_to(cos, (B, S, d))
        sin_signed = jnp.broadcast_to(sin_signed, (B, S, d))

        attn = flash_attention(qkv, cos, sin_signed, B=B, S=S, num_heads=H,
                               num_kv_heads=Hkv, head_dim=d,
                               scale=1.0 / math.sqrt(d),
                               block=self.attn_block)   # (B, S, H*d) bf16

        out = pallas_linear(attn.reshape(B * S, H * d), self.w_o_bf,
                            block=self.linear_block, out_dtype=jnp.float32)
        return out.reshape(B, S, E)


# ----------------------------------------------------------------------------
# Pure-JAX f32 reference (mirrors the PyTorch forward, no-past / no-cache branch)
# ----------------------------------------------------------------------------
def reference_forward(mod, hidden_states, position_ids):
    B, S, E = hidden_states.shape
    H, Hkv, d, n_rep = mod.num_heads, mod.num_kv_heads, mod.head_dim, mod.n_rep
    q = (hidden_states @ mod.w_q).reshape(B, S, H, d).transpose(0, 2, 1, 3)
    k = (hidden_states @ mod.w_k).reshape(B, S, Hkv, d).transpose(0, 2, 1, 3)
    v = (hidden_states @ mod.w_v).reshape(B, S, Hkv, d).transpose(0, 2, 1, 3)
    cos, sin = rotary_cos_sin(position_ids, d, mod.rope_theta)
    q = apply_rope_bhsd(q, cos, sin)
    k = apply_rope_bhsd(k, cos, sin)
    k = jnp.repeat(k, n_rep, axis=1)
    v = jnp.repeat(v, n_rep, axis=1)
    w = jnp.einsum("bhqd,bhkd->bhqk", q, k) / math.sqrt(d)
    neg = jnp.finfo(jnp.float32).min
    causal = jnp.where(jnp.tril(jnp.ones((S, S), dtype=bool)), 0.0, neg)
    w = w + causal[None, None]
    w = jnp.maximum(w, neg)
    w = jax.nn.softmax(w.astype(jnp.float32), axis=-1)
    o = jnp.einsum("bhqk,bhkd->bhqd", w, v)
    o = o.transpose(0, 2, 1, 3).reshape(B, S, H * d)
    return o @ mod.w_o


# ----------------------------------------------------------------------------
if __name__ == "__main__":
    # Small but representative Llama-like shapes (head_dim = 128).
    B, S = 2, 32
    hidden_size, num_heads, num_kv_heads = 512, 4, 2
    rope_theta = 10000.0

    key = jax.random.PRNGKey(0)
    k_param, k_x = jax.random.split(key)

    # Small tile overrides so the test exercises multi-step K accumulation,
    # the triangular flash schedule, GQA grouping, fused RoPE, and masking.
    mod = LlamaAttentionKVmixPallas(hidden_size, num_heads, num_kv_heads,
                                    rope_theta, k_param,
                                    linear_block=(32, 256, 256),
                                    attn_block=(16, 8))

    hidden_states = jax.random.normal(k_x, (B, S, hidden_size), jnp.float32)
    position_ids = jnp.broadcast_to(jnp.arange(S, dtype=jnp.int32)[None, :], (B, S))

    out = mod(hidden_states, position_ids=position_ids)
    out = jax.block_until_ready(out)

    ref = reference_forward(mod, hidden_states, position_ids)
    assert out.shape == (B, S, hidden_size)
    err = float(jnp.max(jnp.abs(out - ref)))
    assert jnp.allclose(out, ref, atol=3e-2, rtol=3e-2), \
        f"mismatch vs reference (max abs err {err})"

    print("KERNEL_OK")
</pallas_src>

<mosaic_0001>
module attributes {stable_mosaic.version = 11 : i64} {
  func.func @_matmul_kernel(%arg0: i32, %arg1: i32, %arg2: i32, %arg3: memref<32x256xbf16, #tpu.memory_space<vmem>>, %arg4: memref<256x256xbf16, #tpu.memory_space<vmem>>, %arg5: memref<32x256xbf16, #tpu.memory_space<vmem>>, %arg6: memref<32x256xf32, #tpu.memory_space<vmem>>) attributes {dimension_semantics = [#tpu.dimension_semantics<parallel>, #tpu.dimension_semantics<parallel>, #tpu.dimension_semantics<arbitrary>], iteration_bounds = array<i64: 2, 4, 2>, scalar_prefetch = 0 : i64, scratch_operands = 1 : i64, tpu.core_type = #tpu.core_type<tc>, window_params = [{transform_indices = @transform_0, window_bounds = array<i64: 32, 256>}, {transform_indices = @transform_1, window_bounds = array<i64: 256, 256>}, {transform_indices = @transform_2, window_bounds = array<i64: 32, 256>}]} {
    %c0_i32 = arith.constant 0 : i32
    %0 = arith.cmpi eq, %arg2, %c0_i32 : i32
    %1 = arith.extui %0 : i1 to i32
    %c0_i32_0 = arith.constant 0 : i32
    %2 = arith.cmpi ne, %1, %c0_i32_0 : i32
    scf.if %2 {
      %cst_9 = arith.constant 0.000000e+00 : f32
      %12 = vector.broadcast %cst_9 : f32 to vector<32x256xf32>
      %c0_10 = arith.constant 0 : index
      %c0_11 = arith.constant 0 : index
      %13 = vector.load %arg6[%c0_10, %c0_11] : memref<32x256xf32, #tpu.memory_space<vmem>>, vector<32x256xf32>
      tpu.vector_store %arg6[%c0_10, %c0_11], %12 {strides = array<i32>} : memref<32x256xf32, #tpu.memory_space<vmem>>, vector<32x256xf32>,
    } else {
    }
    %c0 = arith.constant 0 : index
    %c0_1 = arith.constant 0 : index
    %3 = vector.load %arg6[%c0, %c0_1] : memref<32x256xf32, #tpu.memory_space<vmem>>, vector<32x256xf32>
    %c0_2 = arith.constant 0 : index
    %c0_3 = arith.constant 0 : index
    %4 = vector.load %arg3[%c0_2, %c0_3] : memref<32x256xbf16, #tpu.memory_space<vmem>>, vector<32x256xbf16>
    %c0_4 = arith.constant 0 : index
    %c0_5 = arith.constant 0 : index
    %5 = vector.load %arg4[%c0_4, %c0_5] : memref<256x256xbf16, #tpu.memory_space<vmem>>, vector<256x256xbf16>
    %cst = arith.constant dense<0.000000e+00> : vector<32x256xf32>
    %6 = tpu.matmul %4, %5, %cst {dimension_numbers = #tpu.dot_dimension_numbers<[1], [0], [0], [1], [0, 0, 1, 1], [], []>} : vector<32x256xbf16>, vector<256x256xbf16>, vector<32x256xf32> -> vector<32x256xf32>
    %7 = arith.addf %3, %6 : vector<32x256xf32>
    %c0_6 = arith.constant 0 : index
    %c0_7 = arith.constant 0 : index
    %8 = vector.load %arg6[%c0_6, %c0_7] : memref<32x256xf32, #tpu.memory_space<vmem>>, vector<32x256xf32>
    tpu.vector_store %arg6[%c0_6, %c0_7], %7 {strides = array<i32>} : memref<32x256xf32, #tpu.memory_space<vmem>>, vector<32x256xf32>,
    %c1_i32 = arith.constant 1 : i32
    %9 = arith.cmpi eq, %arg2, %c1_i32 : i32
    %10 = arith.extui %9 : i1 to i32
    %c0_i32_8 = arith.constant 0 : i32
    %11 = arith.cmpi ne, %10, %c0_i32_8 : i32
    scf.if %11 {
      %c0_9 = arith.constant 0 : index
      %c0_10 = arith.constant 0 : index
      %12 = vector.load %arg6[%c0_9, %c0_10] : memref<32x256xf32, #tpu.memory_space<vmem>>, vector<32x256xf32>
      %13 = arith.truncf %12 : vector<32x256xf32> to vector<32x256xbf16>
      %c0_11 = arith.constant 0 : index
      %c0_12 = arith.constant 0 : index
      %14 = vector.load %arg5[%c0_11, %c0_12] : memref<32x256xbf16, #tpu.memory_space<vmem>>, vector<32x256xbf16>
      tpu.vector_store %arg5[%c0_11, %c0_12], %13 {strides = array<i32>} : memref<32x256xbf16, #tpu.memory_space<vmem>>, vector<32x256xbf16>,
    } else {
    }
    return
  }
  func.func @transform_0(%arg0: i32, %arg1: i32, %arg2: i32) -> (i32, i32) {
    %c0_i32 = arith.constant 0 : i32
    return %arg0, %arg2 : i32, i32
  }
  func.func @transform_1(%arg0: i32, %arg1: i32, %arg2: i32) -> (i32, i32) {
    %c0_i32 = arith.constant 0 : i32
    return %arg2, %arg1 : i32, i32
  }
  func.func @transform_2(%arg0: i32, %arg1: i32, %arg2: i32) -> (i32, i32) {
    %c0_i32 = arith.constant 0 : i32
    return %arg0, %arg1 : i32, i32
  }
}

</mosaic_0001>

<bundles_post_ra>
// kernel: tpu_custom_call.1
= control target key start
LH: loop header
LB: loop body
LE: loop exit
PB: predicated region body
PF: predicated region fallthrough
CT: control target
= control target key end

     0   :  { %s1733_s0 = inlined_call_operand.hbm [shape: bf16[64,512], index: 0, kind: input, shape index: {}]   ;;  %s1734_s1 = inlined_call_operand.hbm [shape: bf16[512,1024], index: 1, kind: input, shape index: {}]   ;;  %s1735_s2 = inlined_call_operand.hbm [shape: bf16[64,1024], index: 2, kind: output, shape index: {}]  }
   0x1   :  { %1747 = sst [smem:[#allocation24_spill]] %s1733_s0 }
   0x2   :  { %1748 = sst [smem:[#allocation25_spill]] %s1735_s2 }
   0x3   :  { %7 = vsyncpa [#allocation4], 0 }
   0x4   :  { %9 = vsyncpa [#allocation4 + $0x1], 0 }
   0x5   :  { %10 = vsyncpa [#allocation7], 0 }
   0x6   :  { %12 = vsyncpa [#allocation7 + $0x1], 0 }
   0x7   :  { %13 = vsyncpa [#allocation5], 0 }
   0x8   :  { %15 = vsyncpa [#allocation5 + $0x1], 0  ;;  %s1348_s9 = smov 0   ;;  %s1350_s10 = smov 0  }
   0x9   :  { %s1352_s11 = smov 0   ;;  %s1354_s12 = smov 0  }
   0xa   :  { %s1356_s13 = smov 0   ;;  %s1358_s14 = smov 0  }
   0xb   :  { %s1360_s15 = smov 0   ;;  %s1362_s16 = smov 0  }
   0xc   :  { %s1364_s17 = smov 0   ;;  %s1366_s18 = smov 0  }
   0xd   :  { %s1368_s19 = smov 0   ;;  %s1370_s20 = smov 0  }
   0xe   :  { %s1372_s21 = smov 0   ;;  %s1374_s22 = smov 0  }
   0xf   :  { %s1376_s23 = smov 0   ;;  %s1378_s24 = smov 0  }
  0x10 LB: > { %1749 = sst [smem:[#allocation12_spill]] %s1283_s14  ;;  %s732_s25 = sadd.s32 4294967295, %s1323_s24   ;;  %s1323_s24 = sphi %s1378_s24, %s21_s24   ;;  %s1319_s23 = sphi %s1376_s23, %s1790_s23   ;;  %s1315_s22 = sphi %s1374_s22, %s1801_s22   ;;  %s1311_s21 = sphi %s1372_s21, %s1800_s21   ;;  %s1307_s20 = sphi %s1370_s20, %s1787_s20   ;;  %s1303_s19 = sphi %s1368_s19, %s1799_s19   ;;  %s1299_s18 = sphi %s1366_s18, %s1798_s18   ;;  %s1295_s17 = sphi %s1364_s17, %s1786_s17   ;;  %s1291_s16 = sphi %s1362_s16, %s1797_s16   ;;  %s1287_s15 = sphi %s1360_s15, %s1796_s15   ;;  %s1283_s14 = sphi %s1358_s14, %s1784_s14   ;;  %s1279_s13 = sphi %s1356_s13, %s1795_s13   ;;  %s1275_s12 = sphi %s1354_s12, %s1794_s12   ;;  %s1271_s11 = sphi %s1352_s11, %s1793_s11   ;;  %s1267_s10 = sphi %s1350_s10, %s1792_s10   ;;  %s1263_s9 = sphi %s1348_s9, %s1791_s9  }
  0x11   : > { %1750 = sst [smem:[#allocation13_spill]] %s1295_s17  ;;  %s33_s26 = sadd.s32 1, %s1311_s21 }
  0x12   : > { %1751 = sst [smem:[#allocation14_spill]] %s1299_s18  ;;  %p1428_p0 = scmp.ge.s32.totalorder %s33_s26, 2 }
  0x13   : > { %1752 = sst [smem:[#allocation15_spill]] %s1303_s19  ;;  %p56_p1 = scmp.ne.s32.totalorder %s1295_s17, %s1291_s16 }
  0x14   : > { %1753 = sst [smem:[#allocation16_spill]] %s1307_s20  ;;  %s1803_s26 = smov (%p1428_p0, %s33_s26), 0 }
  0x15   : > { %1754 = sst [smem:[#allocation17_spill]] %s1319_s23  ;;  %p57_p2 = scmp.eq.s32.totalorder %s1323_s24, 0 }
  0x16   : > { %1756 = sst [smem:[#allocation18_spill]] %s1803_s26  ;;  %p62_p3 = scmp.ne.s32.totalorder %s1291_s16, %s1287_s15 }
  0x17   : > { %s1444_s30 = ssub.s32 %s1311_s21, %s1803_s26  ;;  %p1446_p4 = scmp.eq.s32.totalorder %s732_s25, 0 }
  0x18   : > { %p1452_p5 = por %p57_p2, %p56_p1  ;;  %p1456_p6 = scmp.eq.s32.totalorder %s732_s25, 15 }
  0x19   : > { %p1462_p7 = por %p1446_p4, %p62_p3  ;;  %p959_p8 = scmp.lt.s32.totalorder %s1323_s24, 16 }
  0x1a   : > { %s142_s7 = sand.u32 1, %s1295_s17   ;;  %s738_s15 = sshll.u32 %s1311_s21, 1 }
  0x1b   : > { %s1760_s6 = scalar_select %p1462_p7, 1, 0 }
  0x1c   : > { %s736_s8 = sshll.u32 %s142_s7, 5  ;;  %s903_s29 = sshll.u32 %s1319_s23, 4 }
  0x1d   : > { %1761 = sst [smem:[#allocation19_spill]] %s1760_s6  ;;  %s146_s28 = scalar_lea.vmem [#allocation3], %s736_s8 }
  0x1e   : > { %s157_s26 = sshll.u32 %s146_s28, 4  ;;  %s152_s2 = sadd.s32 %s903_s29, %s738_s15  ;;  %s158_s26 = int_to_ptr.vmem [resolvable:$true] %s157_s26 }
  0x1f   : > { %s740_s25 = sshll.u32 %s152_s2, 2  ;;  %p949_p9 = pnand %p959_p8, %p1452_p5 }
  0x20   : > { %s1762_s0 = sld [smem:[#allocation24_spill]]  ;;  %p746_p10 = scmp.ge.s32.totalorder %s1323_s24, 1 }
  0x21   : > { %s143_s28 = scalar_lea.sflag [#allocation4], %s142_s7  ;;  %s1325_s29 = smov 256  }
  0x22   : > { %s1740_s2 = smov 128   ;;  %s1741_s4 = smov 8  }
  0x23   : > { %p190_p11 = scmp.lt.s32.totalorder %s1323_s24, 17  ;;  %s733_s19 = sadd.s32 4294967294, %s1323_s24  }
  0x24   : > { %s36_s20 = sadd.s32 1, %s1315_s22  ;;  %s77_s7 = sadd.s32 1, %s1283_s14 }
  0x25   : > { %p1481_p12 = pnand %p746_p10, %p190_p11  ;;  %s1805_s20 = smov (!%p1428_p0, %s36_s20), %s1315_s22 }
  0x26   : > { %s154_s18 = scalar_lea.hbm %s1762_s0, %s740_s25  ;;  %p84_p13 = scmp.ne.s32.totalorder %s1283_s14, %s1279_s13 }
  0x27   : > { %s155_s6 = sshll.u32 %s154_s18, 4  ;;  %p38_p1 = scmp.ge.s32.totalorder %s1805_s20, 4  ;;  %s156_s6 = int_to_ptr.hbm [resolvable:$true] %s155_s6 }
  0x28   : > { %951 = dma.hbm_to_vmem [thread:$0]  (!%p949_p9), %s156_s6, 512, %s158_s26, %s143_s28, %s1325_s29, %s1740_s2, %s1741_s4  }
  0x29   : > { %p90_p3 = scmp.ne.s32.totalorder %s1279_s13, %s1275_s12  ;;  %p1497_p5 = por %p84_p13, %p57_p2 }
  0x2a   : > { %s105_s6 = sadd.s32 1, %s1271_s11  ;;  %s1807_s20 = smov (%p38_p1, %s1805_s20), 0 }
  0x2b   : > { %1765 = sst [smem:[#allocation20_spill]] %s1807_s20  ;;  %s1766_s8 = sadd.s32 1, %s1319_s23 }
  0x2c   : > { %s1809_s8 = smov (!%p38_p1, %s1766_s8), %s1319_s23  ;;  %s73_s27 = ssub.s32 %s1315_s22, %s1807_s20 }
  0x2d   : > { %p1511_p0 = por %p90_p3, %p1446_p4  ;;  %p42_p2 = scmp.ge.s32.totalorder %s1809_s8, 2 }
  0x2e   : > { %s74_s12 = sor.u32 %s73_s27, %s1444_s30  ;;  %p115_p10 = scmp.ne.s32.totalorder %s1271_s11, %s1267_s10 }
  0x2f   : > { %p75_p9 = scmp.eq.s32.totalorder %s74_s12, 0  ;;  %s1811_s8 = smov (%p42_p2, %s1809_s8), 0 }
  0x30   : > { %1768 = sst [smem:[#allocation21_spill]] %s1811_s8  ;;  %s44_s3 = ssub.s32 %s1319_s23, %s1811_s8 }
  0x31   : > { %s1521_s25 = scalar_select %p75_p9, %s1283_s14, %s77_s7  }
  0x32   : > { %p1527_p11 = por %p1456_p6, %p115_p10  ;;  %s46_s29 = sor.u32 %s1444_s30, %s44_s3 }
  0x33   : > { %1769 = sst [smem:[#allocation22_spill]] %s1521_s25  ;;  %s102_s2 = sor.u32 %s73_s27, %s44_s3 }
  0x34   : > { %p47_p4 = scmp.eq.s32.totalorder %s46_s29, 0  ;;  %p103_p13 = scmp.eq.s32.totalorder %s102_s2, 0 }
  0x35   : > { %p121_p1 = scmp.ne.s32.totalorder %s1267_s10, %s1263_s9  ;;  %p122_p3 = scmp.eq.s32.totalorder %s733_s19, 15 }
  0x36   : > { %s1771_s12 = sadd.s32 1, %s1295_s17  ;;  %s167_s5 = sand.u32 1, %s1283_s14  }
  0x37   : > { %s1537_s4 = scalar_select %p47_p4, %s1295_s17, %s1771_s12  }
  0x38   : > { %s1540_s0 = scalar_select %p103_p13, %s1271_s11, %s105_s6  }
  0x39   : > { %1772 = sst [smem:[#allocation23_spill]] %s1537_s4  ;;  %p1542_p2 = por %p122_p3, %p121_p1 }
  0x3a   : > { %s741_s8 = sshll.u32 %s167_s5, 8  ;;  %s743_s20 = sshll.u32 %s1315_s22, 1 }
  0x3b   : > { %s904_s30 = sshll.u32 %s1311_s21, 8  ;;  %s171_s27 = scalar_lea.vmem [#allocation6], %s741_s8 }
  0x3c   : > { %s182_s3 = sshll.u32 %s171_s27, 4  ;;  %s177_s29 = sadd.s32 %s904_s30, %s743_s20  ;;  %s183_s3 = int_to_ptr.vmem [resolvable:$true] %s182_s3 }
  0x3d   : > { %s745_s2 = sshll.u32 %s177_s29, 2  ;;  %p952_p6 = pnand %p959_p8, %p1497_p5 }
  0x3e   : > { %s179_s6 = scalar_lea.hbm %s1734_s1, %s745_s2  ;;  %s168_s4 = scalar_lea.sflag [#allocation7], %s167_s5 }
  0x3f   : > { %s180_s23 = sshll.u32 %s179_s6, 4  ;;  %s1328_s17 = smov 512   ;;  %s181_s23 = int_to_ptr.hbm [resolvable:$true] %s180_s23 }
  0x40   : > { %s1774_s25 = smov 8   ;;  %s1775_s14 = smov 128  }
  0x41   : > { %954 = dma.hbm_to_vmem [thread:$0]  (!%p952_p6), %s181_s23, 4096, %s183_s3, %s168_s4, %s1328_s17, %s1775_s14, %s1774_s25  }
  0x42   : > { %194 = sbr.rel (%p1481_p12) target bundleno = 331 (0x14b), region = 28  ;;  %s196_s8 = sand.u32 (!%p1481_p12), 1, %s1291_s16  }
  0x43   : > { %s747_s26 = sshll.u32 (!%p1481_p12), %s196_s8, 5  ;;  %s197_s30 = scalar_lea.sflag (!%p1481_p12), [#allocation4], %s196_s8 }
  0x44   : > { %s1561_s27 = scalar_lea.vmem (!%p1481_p12), [#allocation3], %s747_s26 }
  0x47   : > { %1250 = dma.done.wait (%p1462_p7), %s197_s30, 512  }
  0x48   : > { %1252 = vsyncadd (%p1462_p7), %s197_s30, 4294966784  ;;  %s206_s5 = sand.u32 1, %s1279_s13  }
  0x49   : > { %s748_s29 = sshll.u32 %s206_s5, 8  ;;  %s207_s14 = scalar_lea.sflag [#allocation7], %s206_s5 }
  0x4a   : > { %s1568_s17 = scalar_lea.vmem [#allocation6], %s748_s29 }
  0x4b   : > { %1254 = dma.done.wait (%p1511_p0), %s207_s14, 4096  }
  0x4c   : > { %1256 = vsyncadd (%p1511_p0), %s207_s14, 4294963200  ;;  %s234_s23 = sand.u32 1, %s1267_s10   ;;  %s1777_s25 = sld [smem:[#allocation14_spill]] }
  0x4d   : > { %s749_s4 = sshll.u32 %s234_s23, 5 }
  0x4e   : > { %s1577_s18 = scalar_lea.vmem [#allocation8], %s749_s4 }
  0x52   : > { %p750_p7 = scmp.ne.s32.totalorder %s1777_s25, 0 }
  0x54   : > { %246 = sbr.rel (%p750_p7) target bundleno = 98 (0x62), region = 40 }
  0x59   : > { %v1329_v0 = vmov 0.0  }
  0x5a   : > { %247 = vst [vmem:[#allocation2 + $0x30] sm:$0xff] %v1329_v0 }
  0x5b   : > { %248 = vst [vmem:[#allocation2] sm:$0xff] %v1329_v0 }
  0x5c   : > { %249 = vst [vmem:[#allocation2 + $0x18] sm:$0xff] %v1329_v0 }
  0x5d   : > { %250 = vst [vmem:[#allocation2 + $0x10] sm:$0xff] %v1329_v0 }
  0x5e   : > { %251 = vst [vmem:[#allocation2 + $0x8] sm:$0xff] %v1329_v0 }
  0x5f   : > { %252 = vst [vmem:[#allocation2 + $0x20] sm:$0xff] %v1329_v0 }
  0x60   : > { %253 = vst [vmem:[#allocation2 + $0x28] sm:$0xff] %v1329_v0 }
  0x61   : > { %254 = vst [vmem:[#allocation2 + $0x38] sm:$0xff] %v1329_v0 }
  0x62 PF: > { %v825_v1 = vld [vmem:[%s1568_s17 + $0x70] sm:$0xf]  ;;  %v924_v2 = vld [vmem:[%s1568_s17 + $0x74] sm:$0xf0]  ;;  %v923_v6 = vld [vmem:[%s1568_s17 + $0x74] sm:$0xf] }
  0x63   : > { %v889_v3 = vld [vmem:[%s1568_s17 + $0xf0] sm:$0xf]  ;;  %v826_v4 = vor.u32 %v924_v2, %v825_v1  ;;  %v940_v5 = vld [vmem:[%s1568_s17 + $0xf4] sm:$0xf0]  ;;  %v827_v7 = vld [vmem:[%s1568_s17 + $0x78] sm:$0xf0] }
  0x64   : > { %v890_v8 = vor.u32 %v940_v5, %v889_v3  ;;  %v830_v9 = vor.u32 %v923_v6, %v827_v7  ;;  %v939_v10 = vld [vmem:[%s1568_s17 + $0xf4] sm:$0xf]  ;;  %v891_v11 = vld [vmem:[%s1568_s17 + $0xf8] sm:$0xf0]  ;;  %v817_v12 = vld [vmem:[%s1568_s17 + $0x60] sm:$0xf] }
  0x65   : > { %479 = vmatpush.bf16.msra.mxu0 %v826_v4  ;;  %v894_v13 = vor.u32 %v939_v10, %v891_v11  ;;  %v922_v14 = vld [vmem:[%s1568_s17 + $0x64] sm:$0xf0]  ;;  %v881_v15 = vld [vmem:[%s1568_s17 + $0xe0] sm:$0xf]  ;;  %v921_v19 = vld [vmem:[%s1568_s17 + $0x64] sm:$0xf] }
  0x66   : > { %v938_v16 = vld [vmem:[%s1568_s17 + $0xe4] sm:$0xf0]  ;;  %498 = vmatpush.bf16.msra.mxu1 %v890_v8  ;;  %517 = vmatpush.bf16.msra.mxu2 %v830_v9  ;;  %v818_v17 = vor.u32 %v922_v14, %v817_v12  ;;  %v819_v20 = vld [vmem:[%s1568_s17 + $0x68] sm:$0xf0]  ;;  %v937_v21 = vld [vmem:[%s1568_s17 + $0xe4] sm:$0xf] }
  0x67   : > { %v882_v18 = vor.u32 %v938_v16, %v881_v15  ;;  %536 = vmatpush.bf16.msra.mxu3 %v894_v13  ;;  %v822_v22 = vor.u32 %v921_v19, %v819_v20  ;;  %v883_v23 = vld [vmem:[%s1568_s17 + $0xe8] sm:$0xf0]  ;;  %v809_v24 = vld [vmem:[%s1568_s17 + $0x50] sm:$0xf]  ;;  %v920_v25 = vld [vmem:[%s1568_s17 + $0x54] sm:$0xf0] }
  0x68   : > { %v886_v26 = vor.u32 %v937_v21, %v883_v23  ;;  %v873_v27 = vld [vmem:[%s1568_s17 + $0xd0] sm:$0xf]  ;;  %v936_v28 = vld [vmem:[%s1568_s17 + $0xd4] sm:$0xf0]  ;;  %v919_v29 = vld [vmem:[%s1568_s17 + $0x54] sm:$0xf]  ;;  %v810_v30 = vor.u32 %v920_v25, %v809_v24 }
  0x69   : > { %480 = vmatpush.bf16.msra.mxu0 %v818_v17  ;;  %v811_v31 = vld [vmem:[%s1568_s17 + $0x58] sm:$0xf0]  ;;  %v935_v32 = vld [vmem:[%s1568_s17 + $0xd4] sm:$0xf]  ;;  %v874_v34 = vor.u32 %v936_v28, %v873_v27  ;;  %v801_v36 = vld [vmem:[%s1568_s17 + $0x40] sm:$0xf] }
  0x6a   : > { %v875_v33 = vld [vmem:[%s1568_s17 + $0xd8] sm:$0xf0]  ;;  %499 = vmatpush.bf16.msra.mxu1 %v882_v18  ;;  %518 = vmatpush.bf16.msra.mxu2 %v822_v22  ;;  %v814_v35 = vor.u32 %v919_v29, %v811_v31  ;;  %v918_v37 = vld [vmem:[%s1568_s17 + $0x44] sm:$0xf0]  ;;  %v865_v38 = vld [vmem:[%s1568_s17 + $0xc0] sm:$0xf] }
  0x6b   : > { %537 = vmatpush.bf16.msra.mxu3 %v886_v26  ;;  %v878_v39 = vor.u32 %v935_v32, %v875_v33  ;;  %v934_v40 = vld [vmem:[%s1568_s17 + $0xc4] sm:$0xf0]  ;;  %v917_v41 = vld [vmem:[%s1568_s17 + $0x44] sm:$0xf]  ;;  %v803_v42 = vld [vmem:[%s1568_s17 + $0x48] sm:$0xf0]  ;;  %v802_v45 = vor.u32 %v918_v37, %v801_v36 }
  0x6c   : > { %v933_v43 = vld [vmem:[%s1568_s17 + $0xc4] sm:$0xf]  ;;  %v867_v44 = vld [vmem:[%s1568_s17 + $0xc8] sm:$0xf0]  ;;  %v866_v46 = vor.u32 %v934_v40, %v865_v38  ;;  %v806_v47 = vor.u32 %v917_v41, %v803_v42  ;;  %v793_v48 = vld [vmem:[%s1568_s17 + $0x30] sm:$0xf] }
  0x6d   : > { %481 = vmatpush.bf16.msra.mxu0 %v810_v30  ;;  %v916_v49 = vld [vmem:[%s1568_s17 + $0x34] sm:$0xf0]  ;;  %v857_v50 = vld [vmem:[%s1568_s17 + $0xb0] sm:$0xf]  ;;  %v870_v51 = vor.u32 %v933_v43, %v867_v44  ;;  %v915_v53 = vld [vmem:[%s1568_s17 + $0x34] sm:$0xf] }
  0x6e   : > { %500 = vmatpush.bf16.msra.mxu1 %v874_v34  ;;  %519 = vmatpush.bf16.msra.mxu2 %v814_v35  ;;  %v932_v52 = vld [vmem:[%s1568_s17 + $0xb4] sm:$0xf0]  ;;  %v795_v54 = vld [vmem:[%s1568_s17 + $0x38] sm:$0xf0]  ;;  %v931_v55 = vld [vmem:[%s1568_s17 + $0xb4] sm:$0xf]  ;;  %v794_v57 = vor.u32 %v916_v49, %v793_v48 }
  0x6f   : > { %538 = vmatpush.bf16.msra.mxu3 %v878_v39  ;;  %v859_v56 = vld [vmem:[%s1568_s17 + $0xb8] sm:$0xf0]  ;;  %v858_v58 = vor.u32 %v932_v52, %v857_v50  ;;  %v798_v59 = vor.u32 %v915_v53, %v795_v54  ;;  %v785_v60 = vld [vmem:[%s1568_s17 + $0x20] sm:$0xf]  ;;  %v914_v61 = vld [vmem:[%s1568_s17 + $0x24] sm:$0xf0] }
  0x70   : > { %v849_v62 = vld [vmem:[%s1568_s17 + $0xa0] sm:$0xf]  ;;  %v862_v63 = vor.u32 %v931_v55, %v859_v56  ;;  %v930_v0 = vld [vmem:[%s1568_s17 + $0xa4] sm:$0xf0]  ;;  %v913_v1 = vld [vmem:[%s1568_s17 + $0x24] sm:$0xf]  ;;  %v786_v5 = vor.u32 %v914_v61, %v785_v60 }
  0x71   : > { %482 = vmatpush.bf16.msra.mxu0 %v802_v45  ;;  %v787_v2 = vld [vmem:[%s1568_s17 + $0x28] sm:$0xf0]  ;;  %v929_v3 = vld [vmem:[%s1568_s17 + $0xa4] sm:$0xf]  ;;  %v850_v6 = vor.u32 %v930_v0, %v849_v62  ;;  %v777_v8 = vld [vmem:[%s1568_s17 + $0x10] sm:$0xf] }
  0x72   : > { %501 = vmatpush.bf16.msra.mxu1 %v866_v46  ;;  %520 = vmatpush.bf16.msra.mxu2 %v806_v47  ;;  %v851_v4 = vld [vmem:[%s1568_s17 + $0xa8] sm:$0xf0]  ;;  %v790_v7 = vor.u32 %v913_v1, %v787_v2  ;;  %v912_v9 = vld [vmem:[%s1568_s17 + $0x14] sm:$0xf0]  ;;  %v841_v10 = vld [vmem:[%s1568_s17 + $0x90] sm:$0xf] }
  0x73   : > { %539 = vmatpush.bf16.msra.mxu3 %v870_v51  ;;  %v854_v11 = vor.u32 %v929_v3, %v851_v4  ;;  %v928_v12 = vld [vmem:[%s1568_s17 + $0x94] sm:$0xf0]  ;;  %v911_v13 = vld [vmem:[%s1568_s17 + $0x14] sm:$0xf]  ;;  %v779_v14 = vld [vmem:[%s1568_s17 + $0x18] sm:$0xf0]  ;;  %v778_v17 = vor.u32 %v912_v9, %v777_v8 }
  0x74   : > { %v927_v15 = vld [vmem:[%s1568_s17 + $0x94] sm:$0xf]  ;;  %v843_v16 = vld [vmem:[%s1568_s17 + $0x98] sm:$0xf0]  ;;  %v842_v18 = vor.u32 %v928_v12, %v841_v10  ;;  %v782_v19 = vor.u32 %v911_v13, %v779_v14  ;;  %v769_v20 = vld [vmem:[%s1568_s17] sm:$0xf] }
  0x75   : > { %483 = vmatpush.bf16.msra.mxu0 %v794_v57  ;;  %v910_v21 = vld [vmem:[%s1568_s17 + $0x4] sm:$0xf0]  ;;  %v833_v22 = vld [vmem:[%s1568_s17 + $0x80] sm:$0xf]  ;;  %v846_v23 = vor.u32 %v927_v15, %v843_v16  ;;  %v909_v25 = vld [vmem:[%s1568_s17 + $0x4] sm:$0xf] }
  0x76   : > { %502 = vmatpush.bf16.msra.mxu1 %v858_v58  ;;  %521 = vmatpush.bf16.msra.mxu2 %v798_v59  ;;  %v926_v24 = vld [vmem:[%s1568_s17 + $0x84] sm:$0xf0]  ;;  %v771_v26 = vld [vmem:[%s1568_s17 + $0x8] sm:$0xf0]  ;;  %v925_v27 = vld [vmem:[%s1568_s17 + $0x84] sm:$0xf]  ;;  %v770_v29 = vor.u32 %v910_v21, %v769_v20 }
  0x77   : > { %540 = vmatpush.bf16.msra.mxu3 %v862_v63  ;;  %v835_v28 = vld [vmem:[%s1568_s17 + $0x88] sm:$0xf0]  ;;  %v753_v30 = vld [vmem:[%s1561_s27] sm:$0xf]  ;;  %v906_v31 = vld [vmem:[%s1561_s27 + $0x4] sm:$0xf0]  ;;  %v834_v32 = vor.u32 %v926_v24, %v833_v22  ;;  %v774_v33 = vor.u32 %v909_v25, %v771_v26 }
  0x78   : > { %v905_v34 = vld [vmem:[%s1561_s27 + $0x4] sm:$0xf]  ;;  %v755_v35 = vld [vmem:[%s1561_s27 + $0x8] sm:$0xf0]  ;;  %v838_v36 = vor.u32 %v925_v27, %v835_v28  ;;  %v754_v37 = vor.u32 %v906_v31, %v753_v30  ;;  %v761_v39 = vld [vmem:[%s1561_s27 + $0x10] sm:$0xf] }
  0x79   : > { %484 = vmatpush.bf16.msra.mxu0 %v786_v5  ;;  %v758_v38 = vor.u32 %v905_v34, %v755_v35  ;;  %v908_v40 = vld [vmem:[%s1561_s27 + $0x14] sm:$0xf0]  ;;  %v907_v41 = vld [vmem:[%s1561_s27 + $0x14] sm:$0xf]  ;;  %v763_v42 = vld [vmem:[%s1561_s27 + $0x18] sm:$0xf0] }
  0x7a   : > { %503 = vmatpush.bf16.msra.mxu1 %v850_v6  ;;  %522 = vmatpush.bf16.msra.mxu2 %v790_v7  ;;  %v762_v43 = vor.u32 %v908_v40, %v761_v39  ;;  %v766_v44 = vor.u32 %v907_v41, %v763_v42  ;;  %v255_v46 = vld [vmem:[#allocation2 + $0x30] sm:$0xff]  ;;  %v256_v51 = vld [vmem:[#allocation2] sm:$0xff]  ;;  %v257_v55 = vld [vmem:[#allocation2 + $0x18] sm:$0xff]  ;;  %s1778_s15 = sld [smem:[#allocation14_spill]] }
  0x7b   : > { %541 = vmatpush.bf16.msra.mxu3 %v854_v11  ;;  %v258_v61 = vld [vmem:[#allocation2 + $0x10] sm:$0xff]  ;;  %v259_v1 = vld [vmem:[#allocation2 + $0x8] sm:$0xff]  ;;  %v260_v7 = vld [vmem:[#allocation2 + $0x20] sm:$0xff] }
  0x7c   : > { %v261_v11 = vld [vmem:[#allocation2 + $0x28] sm:$0xff] }
  0x7d   : > { %485 = vmatpush.bf16.msra.mxu0 %v778_v17  ;;  %v262_v17 = vld [vmem:[#allocation2 + $0x38] sm:$0xff] }
  0x7e   : > { %504 = vmatpush.bf16.msra.mxu1 %v842_v18  ;;  %523 = vmatpush.bf16.msra.mxu2 %v782_v19 }
  0x7f   : > { %542 = vmatpush.bf16.msra.mxu3 %v846_v23 }
  0x80   : > { %p895_p8 = scmp.ne.s32.totalorder %s1778_s15, 1 }
  0x81   : > { %486 = vmatpush.bf16.msra.mxu0 %v770_v29 }
  0x82   : > { %505 = vmatpush.bf16.msra.mxu1 %v834_v32  ;;  %524 = vmatpush.bf16.msra.mxu2 %v774_v33 }
  0x83   : > { %543 = vmatpush.bf16.msra.mxu3 %v838_v36 }
  0x84   : > { %487 = vmatmul.bf16.vlgmr.msra.gmra.mxu0 %v754_v37 }
  0x85   : > { %506 = vmatmul.bf16.vlgmr.msra.gmra.mxu1 %v758_v38  ;;  %525 = vmatmul.bf16.vlgmr.msra.gmra.mxu2 %v754_v37 }
  0x86   : > { %544 = vmatmul.bf16.vlgmr.msra.gmra.mxu3 %v758_v38 }
  0x94   : > { %492 = vmatmul.bf16.gmra.mxu0 %v762_v43 }
  0x95   : > { %511 = vmatmul.bf16.gmra.mxu1 %v766_v44  ;;  %530 = vmatmul.bf16.gmra.mxu2 %v762_v43 }
  0x96   : > { %549 = vmatmul.bf16.gmra.mxu3 %v766_v44 }
 0x101   : > { %v488_v45 = vpop.f32.mrf.mxu0 }
 0x102   : > { %v507_v47 = vpop.f32.mrf.mxu1 }
 0x103   : > { %v508_v48 = vadd.f32 %v507_v47, %v488_v45 }
 0x105   : > { %v555_v49 = vadd.f32 %v508_v48, %v255_v46 }
 0x107   : > { %563 = vst [vmem:[#allocation2 + $0x30] sm:$0xff] %v555_v49 }
 0x108   : > { %v526_v50 = vpop.f32.mrf.mxu2 }
 0x109   : > { %v545_v52 = vpop.f32.mrf.mxu3  ;;  %v490_v53 = vpop.f32.mrf.mxu0 }
 0x10a   : > { %v546_v54 = vadd.f32 %v545_v52, %v526_v50  ;;  %v509_v56 = vpop.f32.mrf.mxu1 }
 0x10b   : > { %v510_v57 = vadd.f32 %v509_v56, %v490_v53 }
 0x10c   : > { %v556_v58 = vadd.f32 %v546_v54, %v256_v51 }
 0x10d   : > { %v557_v59 = vadd.f32 %v510_v57, %v257_v55 }
 0x10e   : > { %564 = vst [vmem:[#allocation2] sm:$0xff] %v556_v58 }
 0x10f   : > { %565 = vst [vmem:[#allocation2 + $0x18] sm:$0xff] %v557_v59 }
 0x110   : > { %v528_v60 = vpop.f32.mrf.mxu2 }
 0x111   : > { %v547_v62 = vpop.f32.mrf.mxu3  ;;  %v493_v63 = vpop.f32.mrf.mxu0 }
 0x112   : > { %v548_v0 = vadd.f32 %v547_v62, %v528_v60  ;;  %v512_v2 = vpop.f32.mrf.mxu1 }
 0x113   : > { %v513_v3 = vadd.f32 %v512_v2, %v493_v63 }
 0x114   : > { %v558_v4 = vadd.f32 %v548_v0, %v258_v61 }
 0x115   : > { %v559_v5 = vadd.f32 %v513_v3, %v259_v1 }
 0x116   : > { %566 = vst [vmem:[#allocation2 + $0x10] sm:$0xff] %v558_v4 }
 0x117   : > { %567 = vst [vmem:[#allocation2 + $0x8] sm:$0xff] %v559_v5 }
 0x118   : > { %v531_v6 = vpop.f32.mrf.mxu2 }
 0x119   : > { %v550_v8 = vpop.f32.mrf.mxu3  ;;  %v495_v9 = vpop.f32.mrf.mxu0 }
 0x11a   : > { %v551_v10 = vadd.f32 %v550_v8, %v531_v6  ;;  %v514_v12 = vpop.f32.mrf.mxu1 }
 0x11b   : > { %v515_v13 = vadd.f32 %v514_v12, %v495_v9 }
 0x11c   : > { %v560_v14 = vadd.f32 %v551_v10, %v260_v7 }
 0x11d   : > { %v561_v15 = vadd.f32 %v515_v13, %v261_v11 }
 0x11e   : > { %568 = vst [vmem:[#allocation2 + $0x20] sm:$0xff] %v560_v14 }
 0x11f   : > { %569 = vst [vmem:[#allocation2 + $0x28] sm:$0xff] %v561_v15 }
 0x120   : > { %v533_v16 = vpop.f32.mrf.mxu2 }
 0x121   : > { %v552_v18 = vpop.f32.mrf.mxu3 }
 0x122   : > { %v553_v19 = vadd.f32 %v552_v18, %v533_v16  ;;  %574 = sbr.rel (%p895_p8) target bundleno = 305 (0x131), region = 44 }
 0x124   : > { %v562_v20 = vadd.f32 %v553_v19, %v262_v17 }
 0x126   : > { %570 = vst [vmem:[#allocation2 + $0x38] sm:$0xff] %v562_v20 }
 0x127   : > { %v575_v21 = vld [vmem:[#allocation2 + $0x30] sm:$0xff]  ;;  %v576_v22 = vld [vmem:[#allocation2] sm:$0xff]  ;;  %v577_v23 = vld [vmem:[#allocation2 + $0x18] sm:$0xff] }
 0x128   : > { %v583_v24 = vpack.c.bf16 %v576_v22, %v575_v21  ;;  %v578_v25 = vld [vmem:[#allocation2 + $0x10] sm:$0xff]  ;;  %v579_v26 = vld [vmem:[#allocation2 + $0x8] sm:$0xff]  ;;  %v580_v27 = vld [vmem:[#allocation2 + $0x20] sm:$0xff] }
 0x129   : > { %v584_v28 = vpack.c.bf16 %v578_v25, %v577_v23  ;;  %v585_v29 = vpack.c.bf16 %v580_v27, %v579_v26  ;;  %v581_v30 = vld [vmem:[#allocation2 + $0x28] sm:$0xff] }
 0x12a   : > { %587 = vst [vmem:[%s1577_s18] sm:$0xff] %v583_v24 }
 0x12b   : > { %588 = vst [vmem:[%s1577_s18 + $0x8] sm:$0xff] %v584_v28 }
 0x12c   : > { %589 = vst [vmem:[%s1577_s18 + $0x10] sm:$0xff] %v585_v29 }
 0x12d   : > { %v582_v31 = vld [vmem:[#allocation2 + $0x38] sm:$0xff] }
 0x12e   : > { %v586_v32 = vpack.c.bf16 %v582_v31, %v581_v30 }
 0x130   : > { %590 = vst [vmem:[%s1577_s18 + $0x18] sm:$0xff] %v586_v32 }
 0x131 PF: > { %s1779_s3 = sld [smem:[#allocation15_spill]]  ;;  %s607_s6 = sshll.u32 %s1577_s18, 4  ;;  %s608_s6 = int_to_ptr.vmem [resolvable:$true] %s607_s6 }
 0x132   : > { %s1780_s2 = sld [smem:[#allocation16_spill]]  ;;  %s592_s14 = scalar_lea.sflag [#allocation5], %s234_s23 }
 0x133   : > { %s1781_s27 = sld [smem:[#allocation25_spill]] }
 0x137   : > { %s898_s19 = sshll.u32 %s1779_s3, 1 }
 0x138   : > { %s941_s12 = sshll.u32 %s1780_s2, 5 }
 0x139   : > { %s604_s20 = sadd.s32 %s941_s12, %s898_s19  ;;  %s1177_s15 = scalar_lea.hbm %s1781_s27, 256 }
 0x13a   : > { %s900_s8 = sshll.u32 %s604_s20, 2 }
 0x13b   : > { %s606_s5 = scalar_lea.hbm %s1781_s27, %s900_s8 }
 0x13c   : > { %s609_s29 = sshll.u32 %s606_s5, 4  ;;  %s610_s29 = int_to_ptr.hbm [resolvable:$true] %s609_s29 }
 0x13d   : > { %s1171_s17 = sshra.s32 %s610_s29, 4  ;;  %s1172_s17 = int_to_ptr.hbm [resolvable:$true] %s1171_s17 }
 0x13e   : > { %s1173_s4 = scalar_lea.hbm %s1172_s17, 32  ;;  %p1178_p9 = scmp.lt.s32.totalorder %s1172_s17, %s1781_s27 }
 0x13f   : > { %p1174_p12 = scmp.ne.s32.totalorder %s1172_s17, %s1173_s4  ;;  %p1179_p10 = scmp.lt.s32.totalorder %s1177_s15, %s1173_s4 }
 0x141   : > { %p1175_p5 = pnand %p1174_p12, %p1527_p11  ;;  %p1180_p4 = por %p1179_p10, %p1178_p9 }
 0x143   : > { %p1176_p0 = pneg %p1175_p5 }
 0x145   : > { %p1181_p13 = pnand %p1180_p4, %p1176_p0 }
 0x147   : > { %1184 = shalt.err (!%p1181_p13)
}
 0x148   : > { %s1330_s23 = smov 128   ;;  %s1331_s19 = smov 512  }
 0x149   : > { %s1332_s12 = smov 8  }
 0x14a   : > { %946 = dma.vmem_to_hbm [thread:$0]  (%p1527_p11), %s608_s6, 512, %s610_s29, %s592_s14, %s1330_s23, %s1331_s19, %s1332_s12  }
 0x14b PF: > { %p960_p1 = scmp.ge.s32.totalorder %s1323_s24, 2  ;;  %s624_s20 = sand.u32 1, %s1263_s9  }
 0x14c   : > { %s625_s8 = scalar_lea.sflag [#allocation5], %s624_s20 }
 0x14d   : > { %p956_p3 = pnand %p960_p1, %p1542_p2 }
 0x14f   : > { %p957_p6 = pneg %p956_p3 }
 0x151   : > { %1258 = dma.done.wait (%p957_p6), %s625_s8, 512  }
 0x152   : > { %1260 = vsyncadd (%p957_p6), %s625_s8, 4294966784  ;;  %s21_s24 = sadd.s32 1, %s1323_s24   ;;  %s1783_s28 = sld [smem:[#allocation12_spill]] }
 0x153   : > { %p1680_p7 = scmp.ge.s32.totalorder %s21_s24, 18   ;;  %s1784_s14 = sld [smem:[#allocation22_spill]] }
 0x154   : > { %s1785_s6 = sld [smem:[#allocation13_spill]]  ;;  %s1791_s9 = smov %s1267_s10 }
 0x155   : > { %s1786_s17 = sld [smem:[#allocation23_spill]]  ;;  %s1792_s10 = smov %s1271_s11 }
 0x156   : > { %s1787_s20 = sld [smem:[#allocation17_spill]]  ;;  %s1793_s11 = smov %s1540_s0 }
 0x157   : > { %s1788_s7 = sld [smem:[#allocation18_spill]]  ;;  %s1794_s12 = smov %s1279_s13 }
 0x158   : > { %s1789_s30 = sld [smem:[#allocation20_spill]]  ;;  %s1795_s13 = smov %s1783_s28 }
 0x159   : > { %s1790_s23 = sld [smem:[#allocation21_spill]]  ;;  %s1796_s15 = smov %s1291_s16 }
 0x15a   : > { %s1797_s16 = smov %s1785_s6  ;;  %s1798_s18 = smov %s1311_s21 }
 0x15b   : > { %s1799_s19 = smov %s1315_s22  ;;  %20 = sbr.rel (!%p1680_p7) target bundleno = 16 (0x10), region = 94 }
 0x15d   : > { %s1800_s21 = smov %s1788_s7 }
 0x15e   : > { %s1801_s22 = smov %s1789_s30 }
 0x160   :  { %631 = vsyncpa [#allocation4], 1 }
 0x161   :  { %633 = vsyncpa [#allocation4 + $0x1], 1 }
 0x162   :  { %634 = vsyncpa [#allocation7], 1 }
 0x163   :  { %636 = vsyncpa [#allocation7 + $0x1], 1 }
 0x164   :  { %637 = vsyncpa [#allocation5], 1 }
 0x165   :  { %639 = vsyncpa [#allocation5 + $0x1], 1 }

</bundles_post_ra>
